<compile_context>
chip_gen: v6e
topology: v6e:2x2x1
jax: 0.10.0
libtpu: 0.0.40
codegen_flags: <defaults>
</compile_context>

<pallas_src>
import functools

import jax
import jax.numpy as jnp
from jax.experimental import pallas as pl
from jax.experimental.pallas import tpu as pltpu


def mu_sigma_kernel(r_ref, wh_ref, bh_ref, wout_ref, bout_ref, out_ref, *, z_dim):
    # hidden = relu(r @ W_h + b_h), f32 accumulation on the MXU.
    r = r_ref[...]
    hidden = jnp.dot(r, wh_ref[...], preferred_element_type=jnp.float32)
    hidden = jnp.maximum(hidden + bh_ref[...].astype(jnp.float32), 0.0)

    # Single fused matmul producing [mu_pre | sigma_pre] on the shared hidden LHS.
    pre = jnp.dot(hidden.astype(wout_ref.dtype), wout_ref[...],
                  preferred_element_type=jnp.float32)
    pre = pre + bout_ref[...].astype(jnp.float32)

    # Epilogue on the packed slab: identity on mu columns, 0.1 + 0.9*sigmoid on
    # sigma columns. Column-mask select keeps the lane-dense (tile_b, 2*z_dim)
    # layout intact (no narrow slices / re-concats).
    cols = jax.lax.broadcasted_iota(jnp.int32, pre.shape, dimension=1)
    sig = 0.1 + 0.9 * jax.nn.sigmoid(pre)
    out_ref[...] = jnp.where(cols < z_dim, pre, sig).astype(out_ref.dtype)


def mu_sigma_encoder(r, params, *, tile_b=512, compute_dtype=None):
    """r: (B, r_dim) -> (mu, sigma), each (B, z_dim).

    compute_dtype: optionally cast inputs/weights (e.g. jnp.bfloat16) for native
    MXU inputs; accumulation stays f32.
    """
    out_dtype = r.dtype
    B, r_dim = r.shape
    z_dim = params["w_mu"].shape[1]

    w_h, b_h = params["w_h"], params["b_h"]
    # Fuse the two output projections into one weight/bias (mu columns first).
    w_out = jnp.concatenate([params["w_mu"], params["w_sig"]], axis=1)
    b_out = jnp.concatenate([params["b_mu"], params["b_sig"]], axis=1)

    if compute_dtype is not None:
        r = r.astype(compute_dtype)
        w_h, b_h = w_h.astype(compute_dtype), b_h.astype(compute_dtype)
        w_out, b_out = w_out.astype(compute_dtype), b_out.astype(compute_dtype)

    # Clamp the batch tile for tiny inputs (keep it a multiple of 8 sublanes) and
    # pad B up to a whole number of tiles.
    b8 = ((B + 7) // 8) * 8
    tile_b = max(8, min(tile_b, b8))
    n_blocks = pl.cdiv(B, tile_b)
    b_pad = n_blocks * tile_b
    if b_pad != B:
        r = jnp.pad(r, ((0, b_pad - B), (0, 0)))

    kernel = functools.partial(mu_sigma_kernel, z_dim=z_dim)

    out = pl.pallas_call(
        kernel,
        out_shape=jax.ShapeDtypeStruct((b_pad, 2 * z_dim), out_dtype),
        grid=(n_blocks,),
        in_specs=[
            pl.BlockSpec((tile_b, r_dim), lambda i: (i, 0)),        # r: tiled over batch
            pl.BlockSpec((r_dim, r_dim), lambda i: (0, 0)),         # W_h: resident
            pl.BlockSpec((1, r_dim), lambda i: (0, 0)),             # b_h: resident
            pl.BlockSpec((r_dim, 2 * z_dim), lambda i: (0, 0)),     # W_mu||W_sig: resident
            pl.BlockSpec((1, 2 * z_dim), lambda i: (0, 0)),         # b_mu||b_sig: resident
        ],
        out_specs=pl.BlockSpec((tile_b, 2 * z_dim), lambda i: (i, 0)),
        compiler_params=pltpu.CompilerParams(dimension_semantics=("parallel",)),
    )(r, w_h, b_h, w_out, b_out)

    mu = out[:B, :z_dim]
    sigma = out[:B, z_dim:]
    return mu, sigma


def init_params(key, r_dim, z_dim, dtype=jnp.float32):
    """Deterministic init mimicking torch.nn.Linear default (uniform +-1/sqrt(fan_in))."""
    ks = jax.random.split(key, 6)
    bound_r = 1.0 / jnp.sqrt(r_dim)
    return {
        "w_h":   jax.random.uniform(ks[0], (r_dim, r_dim), dtype, -bound_r, bound_r),
        "b_h":   jax.random.uniform(ks[1], (1, r_dim),     dtype, -bound_r, bound_r),
        "w_mu":  jax.random.uniform(ks[2], (r_dim, z_dim), dtype, -bound_r, bound_r),
        "b_mu":  jax.random.uniform(ks[3], (1, z_dim),     dtype, -bound_r, bound_r),
        "w_sig": jax.random.uniform(ks[4], (r_dim, z_dim), dtype, -bound_r, bound_r),
        "b_sig": jax.random.uniform(ks[5], (1, z_dim),     dtype, -bound_r, bound_r),
    }


def reference_forward(r, params):
    hidden = jax.nn.relu(r @ params["w_h"] + params["b_h"])
    mu = hidden @ params["w_mu"] + params["b_mu"]
    sigma = 0.1 + 0.9 * jax.nn.sigmoid(hidden @ params["w_sig"] + params["b_sig"])
    return mu, sigma


if __name__ == "__main__":
    key = jax.random.PRNGKey(0)
    k_param, k_input = jax.random.split(key)

    # Small shapes consistent with the module (r_dim -> hidden -> z_dim).
    B, r_dim, z_dim = 8, 32, 16
    params = init_params(k_param, r_dim, z_dim)
    r = jax.random.normal(k_input, (B, r_dim), jnp.float32)

    # f32 path (exact vs reference).
    mu, sigma = mu_sigma_encoder(r, params)
    jax.block_until_ready((mu, sigma))

    mu_ref, sigma_ref = reference_forward(r, params)
    assert mu.shape == (B, z_dim) and sigma.shape == (B, z_dim)
    assert jnp.allclose(mu, mu_ref, atol=1e-5, rtol=1e-5)
    assert jnp.allclose(sigma, sigma_ref, atol=1e-5, rtol=1e-5)
    assert bool(jnp.all(sigma > 0.1)) and bool(jnp.all(sigma <= 1.0))

    # Larger-batch bf16-MXU path (f32 accumulation): exercises batch tiling,
    # padding of a non-multiple batch, and resident weights across grid steps.
    B2 = 1048  # not a multiple of tile_b -> exercises the pad/slice path
    r2 = jax.random.normal(jax.random.PRNGKey(1), (B2, r_dim), jnp.float32)
    mu2, sigma2 = mu_sigma_encoder(r2, params, tile_b=512, compute_dtype=jnp.bfloat16)
    jax.block_until_ready((mu2, sigma2))
    mu2_ref, sigma2_ref = reference_forward(r2, params)
    assert mu2.shape == (B2, z_dim) and sigma2.shape == (B2, z_dim)
    assert jnp.allclose(mu2, mu2_ref, atol=1e-1, rtol=1e-1)      # bf16 inputs -> loose tol
    assert jnp.allclose(sigma2, sigma2_ref, atol=1e-1, rtol=1e-1)
    assert bool(jnp.all(jnp.isfinite(mu2))) and bool(jnp.all(jnp.isfinite(sigma2)))

    print("KERNEL_OK")
</pallas_src>

<mosaic_0001>
module attributes {stable_mosaic.version = 11 : i64} {
  func.func @mu_sigma_kernel(%arg0: i32, %arg1: memref<8x32xf32, #tpu.memory_space<vmem>>, %arg2: memref<32x32xf32, #tpu.memory_space<vmem>>, %arg3: memref<1x32xf32, #tpu.memory_space<vmem>>, %arg4: memref<32x32xf32, #tpu.memory_space<vmem>>, %arg5: memref<1x32xf32, #tpu.memory_space<vmem>>, %arg6: memref<8x32xf32, #tpu.memory_space<vmem>>) attributes {dimension_semantics = [#tpu.dimension_semantics<parallel>], iteration_bounds = array<i64: 1>, scalar_prefetch = 0 : i64, scratch_operands = 0 : i64, tpu.core_type = #tpu.core_type<tc>, window_params = [{transform_indices = @transform_0, window_bounds = array<i64: 8, 32>}, {pipeline_mode = #tpu.pipeline_mode<synchronous>, transform_indices = @transform_1, window_bounds = array<i64: 32, 32>}, {pipeline_mode = #tpu.pipeline_mode<synchronous>, transform_indices = @transform_2, window_bounds = array<i64: 1, 32>}, {pipeline_mode = #tpu.pipeline_mode<synchronous>, transform_indices = @transform_3, window_bounds = array<i64: 32, 32>}, {pipeline_mode = #tpu.pipeline_mode<synchronous>, transform_indices = @transform_4, window_bounds = array<i64: 1, 32>}, {transform_indices = @transform_5, window_bounds = array<i64: 8, 32>}]} {
    %c0 = arith.constant 0 : index
    %c0_0 = arith.constant 0 : index
    %0 = vector.load %arg1[%c0, %c0_0] : memref<8x32xf32, #tpu.memory_space<vmem>>, vector<8x32xf32>
    %c0_1 = arith.constant 0 : index
    %c0_2 = arith.constant 0 : index
    %1 = vector.load %arg2[%c0_1, %c0_2] : memref<32x32xf32, #tpu.memory_space<vmem>>, vector<32x32xf32>
    %cst = arith.constant dense<0.000000e+00> : vector<8x32xf32>
    %2 = tpu.matmul %0, %1, %cst {dimension_numbers = #tpu.dot_dimension_numbers<[1], [0], [0], [1], [0, 0, 1, 1], [], []>} : vector<8x32xf32>, vector<32x32xf32>, vector<8x32xf32> -> vector<8x32xf32>
    %c0_3 = arith.constant 0 : index
    %c0_4 = arith.constant 0 : index
    %3 = vector.load %arg3[%c0_3, %c0_4] : memref<1x32xf32, #tpu.memory_space<vmem>>, vector<1x32xf32>
    %4 = vector.broadcast %3 : vector<1x32xf32> to vector<8x32xf32>
    %5 = arith.addf %2, %4 : vector<8x32xf32>
    %cst_5 = arith.constant 0.000000e+00 : f32
    %6 = vector.broadcast %cst_5 : f32 to vector<8x32xf32>
    %7 = arith.maximumf %5, %6 : vector<8x32xf32>
    %c0_6 = arith.constant 0 : index
    %c0_7 = arith.constant 0 : index
    %8 = vector.load %arg4[%c0_6, %c0_7] : memref<32x32xf32, #tpu.memory_space<vmem>>, vector<32x32xf32>
    %cst_8 = arith.constant dense<0.000000e+00> : vector<8x32xf32>
    %9 = tpu.matmul %7, %8, %cst_8 {dimension_numbers = #tpu.dot_dimension_numbers<[1], [0], [0], [1], [0, 0, 1, 1], [], []>} : vector<8x32xf32>, vector<32x32xf32>, vector<8x32xf32> -> vector<8x32xf32>
    %c0_9 = arith.constant 0 : index
    %c0_10 = arith.constant 0 : index
    %10 = vector.load %arg5[%c0_9, %c0_10] : memref<1x32xf32, #tpu.memory_space<vmem>>, vector<1x32xf32>
    %11 = vector.broadcast %10 : vector<1x32xf32> to vector<8x32xf32>
    %12 = arith.addf %9, %11 : vector<8x32xf32>
    %13 = tpu.iota {dimensions = array<i32: 1>} : vector<8x32xi32>
    %14 = arith.negf %12 : vector<8x32xf32>
    %15 = math.exp %14 : vector<8x32xf32>
    %cst_11 = arith.constant 1.000000e+00 : f32
    %16 = vector.broadcast %cst_11 : f32 to vector<8x32xf32>
    %17 = arith.addf %16, %15 : vector<8x32xf32>
    %18 = arith.divf %16, %17 : vector<8x32xf32>
    %cst_12 = arith.constant 0.899999976 : f32
    %19 = vector.broadcast %cst_12 : f32 to vector<8x32xf32>
    %20 = arith.mulf %19, %18 : vector<8x32xf32>
    %cst_13 = arith.constant 1.000000e-01 : f32
    %21 = vector.broadcast %cst_13 : f32 to vector<8x32xf32>
    %22 = arith.addf %21, %20 : vector<8x32xf32>
    %c16_i32 = arith.constant 16 : i32
    %23 = vector.broadcast %c16_i32 : i32 to vector<8x32xi32>
    %24 = arith.cmpi slt, %13, %23 : vector<8x32xi32>
    %25 = arith.select %24, %12, %22 : vector<8x32xi1>, vector<8x32xf32>
    %c0_14 = arith.constant 0 : index
    %c0_15 = arith.constant 0 : index
    %26 = vector.load %arg6[%c0_14, %c0_15] : memref<8x32xf32, #tpu.memory_space<vmem>>, vector<8x32xf32>
    tpu.vector_store %arg6[%c0_14, %c0_15], %25 {strides = array<i32>} : memref<8x32xf32, #tpu.memory_space<vmem>>, vector<8x32xf32>,
    return
  }
  func.func @transform_0(%arg0: i32) -> (i32, i32) {
    %c0_i32 = arith.constant 0 : i32
    %c0_i32_0 = arith.constant 0 : i32
    return %arg0, %c0_i32 : i32, i32
  }
  func.func @transform_1(%arg0: i32) -> (i32, i32) {
    %c0_i32 = arith.constant 0 : i32
    %c0_i32_0 = arith.constant 0 : i32
    %c0_i32_1 = arith.constant 0 : i32
    return %c0_i32, %c0_i32_0 : i32, i32
  }
  func.func @transform_2(%arg0: i32) -> (i32, i32) {
    %c0_i32 = arith.constant 0 : i32
    %c0_i32_0 = arith.constant 0 : i32
    %c0_i32_1 = arith.constant 0 : i32
    return %c0_i32, %c0_i32_0 : i32, i32
  }
  func.func @transform_3(%arg0: i32) -> (i32, i32) {
    %c0_i32 = arith.constant 0 : i32
    %c0_i32_0 = arith.constant 0 : i32
    %c0_i32_1 = arith.constant 0 : i32
    return %c0_i32, %c0_i32_0 : i32, i32
  }
  func.func @transform_4(%arg0: i32) -> (i32, i32) {
    %c0_i32 = arith.constant 0 : i32
    %c0_i32_0 = arith.constant 0 : i32
    %c0_i32_1 = arith.constant 0 : i32
    return %c0_i32, %c0_i32_0 : i32, i32
  }
  func.func @transform_5(%arg0: i32) -> (i32, i32) {
    %c0_i32 = arith.constant 0 : i32
    %c0_i32_0 = arith.constant 0 : i32
    return %arg0, %c0_i32 : i32, i32
  }
}

</mosaic_0001>

<bundles_post_ra>
// kernel: tpu_custom_call.1
= control target key start
LH: loop header
LB: loop body
LE: loop exit
PB: predicated region body
PF: predicated region fallthrough
CT: control target
= control target key end

     0   :  { %10 = vsyncpa [#allocation3], 0  ;;  %s454_s0 = inlined_call_operand.hbm [shape: f32[8,32], index: 0, kind: input, shape index: {}]   ;;  %s455_s1 = inlined_call_operand.hbm [shape: f32[32,32], index: 1, kind: input, shape index: {}]   ;;  %s456_s2 = inlined_call_operand.vmem [shape: f32[1,32], index: 2, kind: input, shape index: {}]   ;;  %s457_s3 = inlined_call_operand.hbm [shape: f32[32,32], index: 3, kind: input, shape index: {}]   ;;  %s458_s4 = inlined_call_operand.vmem [shape: f32[1,32], index: 4, kind: input, shape index: {}]   ;;  %s459_s5 = inlined_call_operand.hbm [shape: f32[8,32], index: 5, kind: output, shape index: {}]  }
   0x1   :  { %11 = vsyncpa [#allocation6], 0 }
   0x2   :  { %12 = vsyncpa [#allocation4], 0  ;;  %s395_s18 = smov [#allocation5]  }
   0x3   :  { %s28_s19 = sshll.u32 %s395_s18, 4  ;;  %s29_s19 = int_to_ptr.vmem [resolvable:$true] %s28_s19 }
   0x4   :  { %s317_s20 = scalar_lea.vmem %s29_s19, 512  ;;  %p322_p1 = scmp.lt.s32.totalorder %s29_s19, %s29_s19 }
   0x5   :  { %p318_p0 = scmp.ne.s32.totalorder %s29_s19, %s317_s20  ;;  %p323_p2 = scmp.lt.s32.totalorder %s317_s20, %s317_s20 }
   0x7   :  { %p324_p3 = por %p323_p2, %p322_p1 }
   0x9   :  { %p325_p4 = pnand %p324_p3, %p318_p0 }
   0xb   :  { %328 = shalt.err (!%p325_p4)
}
   0xc   :  { %s396_s21 = smov 128   ;;  %s397_s22 = smov 8  }
   0xd   :  { %34 = dma.hbm_to_vmem [thread:$0]  %s455_s1, 512, %s29_s19, [#allocation6], %s396_s21, %s396_s21, %s397_s22  }
   0xe   :  { %s398_s25 = smov [#allocation2]   ;;  %s399_s27 = smov [#allocation7]  }
   0xf   :  { %s19_s26 = sshll.u32 %s398_s25, 4  ;;  %s42_s28 = sshll.u32 %s399_s27, 4  ;;  %s20_s26 = int_to_ptr.vmem [resolvable:$true] %s19_s26  ;;  %s43_s28 = int_to_ptr.vmem [resolvable:$true] %s42_s28 }
  0x10   :  { %s337_s29 = scalar_lea.vmem %s20_s26, 128  ;;  %p342_p6 = scmp.lt.s32.totalorder %s20_s26, %s20_s26 }
  0x11   :  { %p338_p5 = scmp.ne.s32.totalorder %s20_s26, %s337_s29  ;;  %p343_p7 = scmp.lt.s32.totalorder %s337_s29, %s337_s29 }
  0x13   :  { %p344_p8 = por %p343_p7, %p342_p6 }
  0x15   :  { %p345_p9 = pnand %p344_p8, %p338_p5 }
  0x17   :  { %348 = shalt.err (!%p345_p9)
}
  0x18   :  { %22 = dma.hbm_to_vmem [thread:$0]  %s454_s0, 128, %s20_s26, [#allocation3]  }
  0x19   :  { %s357_s7 = scalar_lea.vmem %s43_s28, 512  ;;  %p362_p11 = scmp.lt.s32.totalorder %s43_s28, %s43_s28 }
  0x1a   :  { %p358_p10 = scmp.ne.s32.totalorder %s43_s28, %s357_s7  ;;  %p363_p12 = scmp.lt.s32.totalorder %s357_s7, %s357_s7 }
  0x1c   :  { %p364_p13 = por %p363_p12, %p362_p11 }
  0x1e   :  { %p365_p0 = pnand %p364_p13, %p358_p10 }
  0x20   :  { %368 = shalt.err (!%p365_p0)
}
  0x21   :  { %48 = dma.hbm_to_vmem [thread:$0]  %s457_s3, 512, %s43_s28, [#allocation6], %s396_s21, %s396_s21, %s397_s22  }
  0x22   :  { %389 = dma.done.wait [#allocation3], 128  }
  0x23   :  { %390 = vsyncadd [#allocation3], 4294967168 }
  0x24   :  { %391 = dma.done.wait [#allocation6], 1024  }
  0x25   :  { %392 = vsyncadd [#allocation6], 4294966272  ;;  %v400_v0 = vmov 0.0   ;;  %vm401_vm0 = vmmov 0   ;;  %v64_v1 = vld [vmem:[#allocation5 + $0x18] sm:$0xff]  ;;  %v63_v2 = vld [vmem:[#allocation5 + $0x10] sm:$0xff]  ;;  %v231_v22 = vlaneseq }
  0x26   :  { %275 = vmatprep.subr.mxu0 %v400_v0  ;;  %283 = vmatprep.mubr.msk.f32.mxu0 %vm401_vm0, %v400_v0  ;;  %v150_v3 = vld [vmem:[#allocation7 + $0x18] sm:$0xff]  ;;  %v62_v4 = vld [vmem:[#allocation5 + $0x8] sm:$0xff]  ;;  %v61_v5 = vld [vmem:[#allocation5] sm:$0xff]  ;;  %vm72_vm1 = vcmask 261120  }
  0x27   :  { %286 = vmatprep.subr.mxu1 %v400_v0  ;;  %294 = vmatprep.mubr.msk.f32.mxu1 %vm401_vm0, %v400_v0  ;;  %v60_v6 = vld [vmem:[#allocation2] sm:$0xff]  ;;  %v149_v7 = vld [vmem:[#allocation7 + $0x10] sm:$0xff]  ;;  %v148_v8 = vld [vmem:[#allocation7 + $0x8] sm:$0xff]  ;;  %v232_v23 = vand.u32 127, %v231_v22 }
  0x28   :  { %276 = vmatpush3.msra.mxu0 %v64_v1  ;;  %287 = vmatpush3.msra.mxu1 %v150_v3  ;;  %v147_v9 = vld [vmem:[#allocation7] sm:$0xff]  ;;  %v260_v10 = vld [vmem:[%s456_s2] ss:$0 sm:$0xff]  ;;  %s402_s2 = smov [#allocation8]  }
  0x29   :  { %277 = vmatprep.subr.mxu0 %v400_v0  ;;  %288 = vmatprep.subr.mxu1 %v400_v0  ;;  %v262_v15 = vld [vmem:[%s458_s4] ss:$0 sm:$0xff]  ;;  %s250_s11 = sshll.u32 %s402_s2, 4  ;;  %vm241_vm2 = vcmp.lt.s32.totalorder %v232_v23, 16  ;;  %s251_s11 = int_to_ptr.vmem [resolvable:$true] %s250_s11 }
  0x2a   :  { %278 = vmatpush3.msra.mxu0 %v63_v2  ;;  %289 = vmatpush3.msra.mxu1 %v149_v7  ;;  %s369_s4 = scalar_lea.vmem %s251_s11, 128  ;;  %p374_p2 = scmp.lt.s32.totalorder %s251_s11, %s251_s11 }
  0x2b   :  { %279 = vmatprep.subr.mxu0 %v400_v0  ;;  %290 = vmatprep.subr.mxu1 %v400_v0  ;;  %p370_p1 = scmp.ne.s32.totalorder %s251_s11, %s369_s4  ;;  %p375_p3 = scmp.lt.s32.totalorder %s369_s4, %s369_s4 }
  0x2c   :  { %280 = vmatpush3.msra.mxu0 %v62_v4  ;;  %291 = vmatpush3.msra.mxu1 %v148_v8 }
  0x2d   :  { %281 = vmatprep.subr.mxu0 %v400_v0  ;;  %292 = vmatprep.subr.mxu1 %v400_v0  ;;  %p376_p4 = por %p375_p3, %p374_p2 }
  0x2e   :  { %282 = vmatpush3.msra.mxu0 %v61_v5  ;;  %293 = vmatpush3.msra.mxu1 %v147_v9 }
  0x2f   :  { %284 = vmatmul.mubr.msk.f32.vlgmr.msra.gmra.mxu0 %vm72_vm1, %v60_v6  ;;  %p377_p5 = pnand %p376_p4, %p370_p1 }
  0xef   :  { %v142_v11 = vpop.f32.mrf.mxu0 }
  0xf0   :  { %v143_v12 = vadd.f32 %v260_v10, %v142_v11 }
  0xf1   :  { %v285_v13 = vpop.f32.mrf.mxu0 }
  0xf2   :  { %v146_v14 = vmax.f32 %v143_v12, 0.0 }
  0xf4   :  { %295 = vmatmul.mubr.msk.f32.vlgmr.msra.gmra.mxu1 %vm72_vm1, %v146_v14 }
 0x1b4   :  { %v227_v16 = vpop.f32.mrf.mxu1 }
 0x1b5   :  { %v228_v17 = vadd.f32 %v262_v15, %v227_v16 }
 0x1b6   :  { %v296_v18 = vpop.f32.mrf.mxu1 }
 0x1b7   :  { %v264_v19 = vmul.f32 -1.442695, %v228_v17 }
 0x1b9   :  { %305 = vpow2.f32 %v264_v19 }
 0x1c6   :  { %v306_v20 = vpop.eup %305 }
 0x1c7   :  { %v236_v21 = vadd.f32 1.0, %v306_v20 }
 0x1c9   :  { %307 = vrcp.f32 %v236_v21 }
 0x1d6   :  { %v308_v24 = vpop.eup %307 }
 0x1d7   :  { %v239_v25 = vmul.f32 0.9, %v308_v24 }
 0x1d9   :  { %v240_v26 = vadd.f32 0.1, %v239_v25 }
 0x1db   :  { %v242_v27 = vsel %vm241_vm2, %v228_v17, %v240_v26 }
 0x1dc   :  { %243 = vst.msk [vmem:[#allocation8] sm:$0xff] %vm72_vm1, %v242_v27 }
 0x1dd   :  { %380 = shalt.err (!%p377_p5)
}
 0x1de   :  { %253 = dma.vmem_to_hbm [thread:$0]  %s251_s11, 128, %s459_s5, [#allocation4]  }
 0x1df   :  { %393 = dma.done.wait [#allocation4], 128  }
 0x1e0   :  { %394 = vsyncadd [#allocation4], 4294967168 }
 0x1e1   :  { %257 = vsyncpa [#allocation3], 1 }
 0x1e2   :  { %258 = vsyncpa [#allocation6], 1 }
 0x1e3   :  { %259 = vsyncpa [#allocation4], 1 }

</bundles_post_ra>
